<compile_context>
chip_gen: v7x
topology: tpu7x:2x2x1
jax: 0.10.0
libtpu: 0.0.40
codegen_flags: <defaults>
</compile_context>

<pallas_src>
import functools

import jax
import jax.numpy as jnp
from jax import lax
from jax.experimental import pallas as pl
from jax.experimental.pallas import tpu as pltpu


def _sigmoid(z):
    return 1.0 / (1.0 + jnp.exp(-z))


# --------------------------- LSTM layer kernel ------------------------------

def _lstm_layer_kernel(x_ref, wih_ref, whh_ref, b_ref,   # inputs
                       y_ref, hlast_ref,                 # outputs
                       h_scr, c_scr,                     # VMEM scratch
                       *, hidden):
    t = pl.program_id(0)

    @pl.when(t == 0)
    def _init():
        h_scr[...] = jnp.zeros_like(h_scr)
        c_scr[...] = jnp.zeros_like(c_scr)

    x_t = x_ref[...]              # (Bp, D_in)
    h_prev = h_scr[...]           # (Bp, H)
    c_prev = c_scr[...]           # (Bp, H)

    # Fused gates, PyTorch order [i, f, g, o]:  (Bp, 4H)
    gates = (jnp.dot(x_t, wih_ref[...], preferred_element_type=jnp.float32)
             + jnp.dot(h_prev, whh_ref[...], preferred_element_type=jnp.float32)
             + b_ref[...])

    i_g = _sigmoid(gates[:, 0 * hidden:1 * hidden])
    f_g = _sigmoid(gates[:, 1 * hidden:2 * hidden])
    g_g = jnp.tanh(gates[:, 2 * hidden:3 * hidden])
    o_g = _sigmoid(gates[:, 3 * hidden:4 * hidden])

    c_new = f_g * c_prev + i_g * g_g
    h_new = o_g * jnp.tanh(c_new)

    h_scr[...] = h_new
    c_scr[...] = c_new
    y_ref[...] = h_new            # streamed per-step output
    hlast_ref[...] = h_new        # resident block: last write is the final h


def _lstm_layer_pallas(x_tbd, w_ih, w_hh, b_ih, b_hh, hidden):
    """One LSTM layer, one direction.  x_tbd: (T, Bp, D_in) f32, time-major."""
    T, Bp, D = x_tbd.shape
    H = hidden
    wih_t = jnp.transpose(w_ih).astype(jnp.float32)        # (D, 4H)
    whh_t = jnp.transpose(w_hh).astype(jnp.float32)        # (H, 4H)
    bias = (b_ih + b_hh).astype(jnp.float32)[None, :]       # (1, 4H)

    kernel = functools.partial(_lstm_layer_kernel, hidden=H)
    y_seq, h_last = pl.pallas_call(
        kernel,
        out_shape=(jax.ShapeDtypeStruct((T, Bp, H), jnp.float32),
                   jax.ShapeDtypeStruct((Bp, H), jnp.float32)),
        grid_spec=pltpu.PrefetchScalarGridSpec(
            num_scalar_prefetch=0,
            grid=(T,),
            in_specs=[
                pl.BlockSpec((None, Bp, D), lambda t: (t, 0, 0)),   # x_t streamed
                pl.BlockSpec((D, 4 * H), lambda t: (0, 0)),         # W_ih^T resident
                pl.BlockSpec((H, 4 * H), lambda t: (0, 0)),         # W_hh^T resident
                pl.BlockSpec((1, 4 * H), lambda t: (0, 0)),         # bias resident
            ],
            out_specs=(
                pl.BlockSpec((None, Bp, H), lambda t: (t, 0, 0)),   # y_t streamed
                pl.BlockSpec((Bp, H), lambda t: (0, 0)),            # final h resident
            ),
            scratch_shapes=[pltpu.VMEM((Bp, H), jnp.float32),       # h state
                            pltpu.VMEM((Bp, H), jnp.float32)],      # c state
        ),
        compiler_params=pltpu.CompilerParams(
            dimension_semantics=("arbitrary",)),   # time recurrence: sequential
    )(x_tbd, wih_t, whh_t, bias)
    return y_seq, h_last


# ------------------------------ Linear kernel -------------------------------

def _linear_kernel(x_ref, wT_ref, b_ref, o_ref):
    o_ref[...] = (jnp.dot(x_ref[...], wT_ref[...],
                          preferred_element_type=jnp.float32) + b_ref[...])


def _linear_pallas(x, w, b):
    """x: (Bp, F), w: (O, F), b: (O,)  ->  (Bp, O)."""
    Bp, F = x.shape
    O = w.shape[0]
    wT = jnp.transpose(w).astype(jnp.float32)
    b2 = b.astype(jnp.float32)[None, :]
    return pl.pallas_call(
        _linear_kernel,
        out_shape=jax.ShapeDtypeStruct((Bp, O), jnp.float32),
        grid_spec=pltpu.PrefetchScalarGridSpec(
            num_scalar_prefetch=0,
            grid=(1,),
            in_specs=[pl.BlockSpec((Bp, F), lambda i: (0, 0)),
                      pl.BlockSpec((F, O), lambda i: (0, 0)),
                      pl.BlockSpec((1, O), lambda i: (0, 0))],
            out_specs=pl.BlockSpec((Bp, O), lambda i: (0, 0)),
        ),
        compiler_params=pltpu.CompilerParams(
            dimension_semantics=("arbitrary",)),
    )(x.astype(jnp.float32), wT, b2)


# --------------------------- Full module forward ----------------------------

def lstm_forward(x, params, *, hidden_size, num_layer, bidirectional):
    """Pallas equivalent of the PyTorch module's forward: returns (out, hn)."""
    B, T, D = x.shape
    num_dir = 2 if bidirectional else 1
    Bp = ((B + 7) // 8) * 8                                  # sublane-pad batch
    x_p = jnp.zeros((Bp, T, D), jnp.float32).at[:B].set(x.astype(jnp.float32))
    layer_in = jnp.transpose(x_p, (1, 0, 2))                 # time-major (T, Bp, D)

    hn_parts = []
    for layer in range(num_layer):
        outs = []
        for d in range(num_dir):
            w_ih, w_hh, b_ih, b_hh = params["lstm"][layer][d]
            xs = layer_in[::-1] if d == 1 else layer_in      # reverse direction
            y, h_last = _lstm_layer_pallas(xs, w_ih, w_hh, b_ih, b_hh, hidden_size)
            if d == 1:
                y = y[::-1]
            outs.append(y)
            hn_parts.append(h_last)
        layer_in = outs[0] if num_dir == 1 else jnp.concatenate(outs, axis=-1)

    last_step = layer_in[-1]                                 # out[:, -1, :]
    out = _linear_pallas(last_step, params["fc_w"], params["fc_b"])
    hn = jnp.stack(hn_parts, axis=0)                         # (num_dir*L, Bp, H)
    return out[:B], hn[:, :B, :]


# ---------------------------- Params & reference ----------------------------

def _init_params(key, input_size, hidden_size, output_size, num_layer,
                 bidirectional):
    num_dir = 2 if bidirectional else 1
    bound = 1.0 / (hidden_size ** 0.5)
    lstm = []
    for layer in range(num_layer):
        d_in = input_size if layer == 0 else num_dir * hidden_size
        dirs = []
        for _ in range(num_dir):
            key, k1, k2, k3, k4 = jax.random.split(key, 5)
            dirs.append((
                jax.random.uniform(k1, (4 * hidden_size, d_in), jnp.float32,
                                   -bound, bound),
                jax.random.uniform(k2, (4 * hidden_size, hidden_size),
                                   jnp.float32, -bound, bound),
                jax.random.uniform(k3, (4 * hidden_size,), jnp.float32,
                                   -bound, bound),
                jax.random.uniform(k4, (4 * hidden_size,), jnp.float32,
                                   -bound, bound),
            ))
        lstm.append(dirs)
    fan_in = num_dir * hidden_size
    fb = 1.0 / (fan_in ** 0.5)
    key, kw, kb = jax.random.split(key, 3)
    fc_w = jax.random.uniform(kw, (output_size, fan_in), jnp.float32, -fb, fb)
    fc_b = jax.random.uniform(kb, (output_size,), jnp.float32, -fb, fb)
    return {"lstm": lstm, "fc_w": fc_w, "fc_b": fc_b}


def _lstm_forward_ref(x, params, *, hidden_size, num_layer, bidirectional):
    """Pure-JAX reference (lax.scan, HIGHEST-precision matmuls)."""
    num_dir = 2 if bidirectional else 1
    B = x.shape[0]
    H = hidden_size
    hp = lax.Precision.HIGHEST

    def cell_scan(x_tbd, w_ih, w_hh, b_ih, b_hh):
        def step(carry, x_t):
            h, c = carry
            gates = (jnp.dot(x_t, w_ih.T, precision=hp)
                     + jnp.dot(h, w_hh.T, precision=hp) + b_ih + b_hh)
            i = jax.nn.sigmoid(gates[:, :H])
            f = jax.nn.sigmoid(gates[:, H:2 * H])
            g = jnp.tanh(gates[:, 2 * H:3 * H])
            o = jax.nn.sigmoid(gates[:, 3 * H:])
            c = f * c + i * g
            h = o * jnp.tanh(c)
            return (h, c), h
        h0 = jnp.zeros((B, H), jnp.float32)
        (h_T, _), ys = lax.scan(step, (h0, h0), x_tbd)
        return ys, h_T

    layer_in = jnp.transpose(x.astype(jnp.float32), (1, 0, 2))
    hns = []
    for layer in range(num_layer):
        outs = []
        for d in range(num_dir):
            w_ih, w_hh, b_ih, b_hh = params["lstm"][layer][d]
            xs = layer_in[::-1] if d == 1 else layer_in
            y, h_T = cell_scan(xs, w_ih, w_hh, b_ih, b_hh)
            if d == 1:
                y = y[::-1]
            outs.append(y)
            hns.append(h_T)
        layer_in = outs[0] if num_dir == 1 else jnp.concatenate(outs, axis=-1)
    out = jnp.dot(layer_in[-1], params["fc_w"].T, precision=hp) + params["fc_b"]
    return out, jnp.stack(hns, axis=0)


# ------------------------------------ main -----------------------------------

if __name__ == "__main__":
    INPUT_SIZE, HIDDEN_SIZE, OUTPUT_SIZE = 16, 32, 4
    NUM_LAYER, BIDIRECTIONAL = 2, True
    BATCH, SEQ = 2, 8
    NUM_DIR = 2 if BIDIRECTIONAL else 1

    root = jax.random.PRNGKey(0)
    kx, kp = jax.random.split(root)
    x = jax.random.normal(kx, (BATCH, SEQ, INPUT_SIZE), dtype=jnp.float32)
    params = _init_params(kp, INPUT_SIZE, HIDDEN_SIZE, OUTPUT_SIZE,
                          NUM_LAYER, BIDIRECTIONAL)

    out, hn = lstm_forward(x, params, hidden_size=HIDDEN_SIZE,
                           num_layer=NUM_LAYER, bidirectional=BIDIRECTIONAL)
    out = jax.block_until_ready(out)
    hn = jax.block_until_ready(hn)

    out_ref, hn_ref = _lstm_forward_ref(x, params, hidden_size=HIDDEN_SIZE,
                                        num_layer=NUM_LAYER,
                                        bidirectional=BIDIRECTIONAL)

    assert out.shape == (BATCH, OUTPUT_SIZE), out.shape
    assert hn.shape == (NUM_DIR * NUM_LAYER, BATCH, HIDDEN_SIZE), hn.shape
    assert jnp.allclose(out, out_ref, rtol=5e-3, atol=5e-3), (out, out_ref)
    assert jnp.allclose(hn, hn_ref, rtol=5e-3, atol=5e-3), (hn, hn_ref)

    print("KERNEL_OK")
</pallas_src>

<mosaic_0001>
module attributes {stable_mosaic.version = 11 : i64} {
  func.func @_lstm_layer_kernel(%arg0: i32, %arg1: memref<1x8x16xf32, #tpu.memory_space<vmem>>, %arg2: memref<16x128xf32, #tpu.memory_space<vmem>>, %arg3: memref<32x128xf32, #tpu.memory_space<vmem>>, %arg4: memref<1x128xf32, #tpu.memory_space<vmem>>, %arg5: memref<1x8x32xf32, #tpu.memory_space<vmem>>, %arg6: memref<8x32xf32, #tpu.memory_space<vmem>>, %arg7: memref<8x32xf32, #tpu.memory_space<vmem>>, %arg8: memref<8x32xf32, #tpu.memory_space<vmem>>) attributes {dimension_semantics = [#tpu.dimension_semantics<arbitrary>], iteration_bounds = array<i64: 8>, scalar_prefetch = 0 : i64, scratch_operands = 2 : i64, tpu.core_type = #tpu.core_type<tc>, window_params = [{transform_indices = @transform_0, window_bounds = array<i64: 1, 8, 16>}, {pipeline_mode = #tpu.pipeline_mode<synchronous>, transform_indices = @transform_1, window_bounds = array<i64: 16, 128>}, {pipeline_mode = #tpu.pipeline_mode<synchronous>, transform_indices = @transform_2, window_bounds = array<i64: 32, 128>}, {pipeline_mode = #tpu.pipeline_mode<synchronous>, transform_indices = @transform_3, window_bounds = array<i64: 1, 128>}, {transform_indices = @transform_4, window_bounds = array<i64: 1, 8, 32>}, {pipeline_mode = #tpu.pipeline_mode<synchronous>, transform_indices = @transform_5, window_bounds = array<i64: 8, 32>}]} {
    %c0_i32 = arith.constant 0 : i32
    %0 = arith.cmpi eq, %arg0, %c0_i32 : i32
    %1 = arith.extui %0 : i1 to i32
    %c0_i32_0 = arith.constant 0 : i32
    %2 = arith.cmpi ne, %1, %c0_i32_0 : i32
    scf.if %2 {
      %cst_32 = arith.constant 0.000000e+00 : f32
      %52 = vector.broadcast %cst_32 : f32 to vector<8x32xf32>
      %c0_33 = arith.constant 0 : index
      %c0_34 = arith.constant 0 : index
      %53 = vector.load %arg7[%c0_33, %c0_34] : memref<8x32xf32, #tpu.memory_space<vmem>>, vector<8x32xf32>
      tpu.vector_store %arg7[%c0_33, %c0_34], %52 {strides = array<i32>} : memref<8x32xf32, #tpu.memory_space<vmem>>, vector<8x32xf32>,
      %cst_35 = arith.constant 0.000000e+00 : f32
      %54 = vector.broadcast %cst_35 : f32 to vector<8x32xf32>
      %c0_36 = arith.constant 0 : index
      %c0_37 = arith.constant 0 : index
      %55 = vector.load %arg8[%c0_36, %c0_37] : memref<8x32xf32, #tpu.memory_space<vmem>>, vector<8x32xf32>
      tpu.vector_store %arg8[%c0_36, %c0_37], %54 {strides = array<i32>} : memref<8x32xf32, #tpu.memory_space<vmem>>, vector<8x32xf32>,
    } else {
    }
    %c0 = arith.constant 0 : index
    %c0_1 = arith.constant 0 : index
    %c0_2 = arith.constant 0 : index
    %3 = vector.load %arg1[%c0, %c0_1, %c0_2] : memref<1x8x16xf32, #tpu.memory_space<vmem>>, vector<1x8x16xf32>
    %4 = vector.shape_cast %3 : vector<1x8x16xf32> to vector<8x16xf32>
    %c0_3 = arith.constant 0 : index
    %c0_4 = arith.constant 0 : index
    %5 = vector.load %arg7[%c0_3, %c0_4] : memref<8x32xf32, #tpu.memory_space<vmem>>, vector<8x32xf32>
    %c0_5 = arith.constant 0 : index
    %c0_6 = arith.constant 0 : index
    %6 = vector.load %arg8[%c0_5, %c0_6] : memref<8x32xf32, #tpu.memory_space<vmem>>, vector<8x32xf32>
    %c0_7 = arith.constant 0 : index
    %c0_8 = arith.constant 0 : index
    %7 = vector.load %arg2[%c0_7, %c0_8] : memref<16x128xf32, #tpu.memory_space<vmem>>, vector<16x128xf32>
    %cst = arith.constant dense<0.000000e+00> : vector<8x128xf32>
    %8 = tpu.matmul %4, %7, %cst {dimension_numbers = #tpu.dot_dimension_numbers<[1], [0], [0], [1], [0, 0, 1, 1], [], []>} : vector<8x16xf32>, vector<16x128xf32>, vector<8x128xf32> -> vector<8x128xf32>
    %c0_9 = arith.constant 0 : index
    %c0_10 = arith.constant 0 : index
    %9 = vector.load %arg3[%c0_9, %c0_10] : memref<32x128xf32, #tpu.memory_space<vmem>>, vector<32x128xf32>
    %cst_11 = arith.constant dense<0.000000e+00> : vector<8x128xf32>
    %10 = tpu.matmul %5, %9, %cst_11 {dimension_numbers = #tpu.dot_dimension_numbers<[1], [0], [0], [1], [0, 0, 1, 1], [], []>} : vector<8x32xf32>, vector<32x128xf32>, vector<8x128xf32> -> vector<8x128xf32>
    %11 = arith.addf %8, %10 : vector<8x128xf32>
    %c0_12 = arith.constant 0 : index
    %c0_13 = arith.constant 0 : index
    %12 = vector.load %arg4[%c0_12, %c0_13] : memref<1x128xf32, #tpu.memory_space<vmem>>, vector<1x128xf32>
    %13 = vector.broadcast %12 : vector<1x128xf32> to vector<8x128xf32>
    %14 = arith.addf %11, %13 : vector<8x128xf32>
    %15 = vector.extract_strided_slice %14 {offsets = [0, 0], sizes = [8, 32], strides = [1, 1]} : vector<8x128xf32> to vector<8x32xf32>
    %cst_14 = arith.constant 0.000000e+00 : f32
    %16 = vector.broadcast %cst_14 : f32 to vector<8x32xf32>
    %17 = arith.subf %16, %15 : vector<8x32xf32>
    %18 = math.exp %17 : vector<8x32xf32>
    %cst_15 = arith.constant 1.000000e+00 : f32
    %19 = vector.broadcast %cst_15 : f32 to vector<8x32xf32>
    %20 = arith.addf %19, %18 : vector<8x32xf32>
    %cst_16 = arith.constant 1.000000e+00 : f32
    %21 = vector.broadcast %cst_16 : f32 to vector<8x32xf32>
    %22 = arith.divf %21, %20 : vector<8x32xf32>
    %23 = vector.extract_strided_slice %14 {offsets = [0, 32], sizes = [8, 32], strides = [1, 1]} : vector<8x128xf32> to vector<8x32xf32>
    %cst_17 = arith.constant 0.000000e+00 : f32
    %24 = vector.broadcast %cst_17 : f32 to vector<8x32xf32>
    %25 = arith.subf %24, %23 : vector<8x32xf32>
    %26 = math.exp %25 : vector<8x32xf32>
    %cst_18 = arith.constant 1.000000e+00 : f32
    %27 = vector.broadcast %cst_18 : f32 to vector<8x32xf32>
    %28 = arith.addf %27, %26 : vector<8x32xf32>
    %cst_19 = arith.constant 1.000000e+00 : f32
    %29 = vector.broadcast %cst_19 : f32 to vector<8x32xf32>
    %30 = arith.divf %29, %28 : vector<8x32xf32>
    %31 = vector.extract_strided_slice %14 {offsets = [0, 64], sizes = [8, 32], strides = [1, 1]} : vector<8x128xf32> to vector<8x32xf32>
    %32 = math.tanh %31 : vector<8x32xf32>
    %33 = vector.extract_strided_slice %14 {offsets = [0, 96], sizes = [8, 32], strides = [1, 1]} : vector<8x128xf32> to vector<8x32xf32>
    %cst_20 = arith.constant 0.000000e+00 : f32
    %34 = vector.broadcast %cst_20 : f32 to vector<8x32xf32>
    %35 = arith.subf %34, %33 : vector<8x32xf32>
    %36 = math.exp %35 : vector<8x32xf32>
    %cst_21 = arith.constant 1.000000e+00 : f32
    %37 = vector.broadcast %cst_21 : f32 to vector<8x32xf32>
    %38 = arith.addf %37, %36 : vector<8x32xf32>
    %cst_22 = arith.constant 1.000000e+00 : f32
    %39 = vector.broadcast %cst_22 : f32 to vector<8x32xf32>
    %40 = arith.divf %39, %38 : vector<8x32xf32>
    %41 = arith.mulf %30, %6 : vector<8x32xf32>
    %42 = arith.mulf %22, %32 : vector<8x32xf32>
    %43 = arith.addf %41, %42 : vector<8x32xf32>
    %44 = math.tanh %43 : vector<8x32xf32>
    %45 = arith.mulf %40, %44 : vector<8x32xf32>
    %c0_23 = arith.constant 0 : index
    %c0_24 = arith.constant 0 : index
    %46 = vector.load %arg7[%c0_23, %c0_24] : memref<8x32xf32, #tpu.memory_space<vmem>>, vector<8x32xf32>
    tpu.vector_store %arg7[%c0_23, %c0_24], %45 {strides = array<i32>} : memref<8x32xf32, #tpu.memory_space<vmem>>, vector<8x32xf32>,
    %c0_25 = arith.constant 0 : index
    %c0_26 = arith.constant 0 : index
    %47 = vector.load %arg8[%c0_25, %c0_26] : memref<8x32xf32, #tpu.memory_space<vmem>>, vector<8x32xf32>
    tpu.vector_store %arg8[%c0_25, %c0_26], %43 {strides = array<i32>} : memref<8x32xf32, #tpu.memory_space<vmem>>, vector<8x32xf32>,
    %c0_27 = arith.constant 0 : index
    %c0_28 = arith.constant 0 : index
    %c0_29 = arith.constant 0 : index
    %48 = vector.load %arg5[%c0_27, %c0_28, %c0_29] : memref<1x8x32xf32, #tpu.memory_space<vmem>>, vector<1x8x32xf32>
    %49 = vector.shape_cast %48 : vector<1x8x32xf32> to vector<8x32xf32>
    %50 = vector.shape_cast %45 : vector<8x32xf32> to vector<1x8x32xf32>
    tpu.vector_store %arg5[%c0_27, %c0_28, %c0_29], %50 {strides = array<i32>} : memref<1x8x32xf32, #tpu.memory_space<vmem>>, vector<1x8x32xf32>,
    %c0_30 = arith.constant 0 : index
    %c0_31 = arith.constant 0 : index
    %51 = vector.load %arg6[%c0_30, %c0_31] : memref<8x32xf32, #tpu.memory_space<vmem>>, vector<8x32xf32>
    tpu.vector_store %arg6[%c0_30, %c0_31], %45 {strides = array<i32>} : memref<8x32xf32, #tpu.memory_space<vmem>>, vector<8x32xf32>,
    return
  }
  func.func @transform_0(%arg0: i32) -> (i32, i32, i32) {
    %c0_i32 = arith.constant 0 : i32
    %c0_i32_0 = arith.constant 0 : i32
    %c0_i32_1 = arith.constant 0 : i32
    return %arg0, %c0_i32, %c0_i32_0 : i32, i32, i32
  }
  func.func @transform_1(%arg0: i32) -> (i32, i32) {
    %c0_i32 = arith.constant 0 : i32
    %c0_i32_0 = arith.constant 0 : i32
    %c0_i32_1 = arith.constant 0 : i32
    return %c0_i32, %c0_i32_0 : i32, i32
  }
  func.func @transform_2(%arg0: i32) -> (i32, i32) {
    %c0_i32 = arith.constant 0 : i32
    %c0_i32_0 = arith.constant 0 : i32
    %c0_i32_1 = arith.constant 0 : i32
    return %c0_i32, %c0_i32_0 : i32, i32
  }
  func.func @transform_3(%arg0: i32) -> (i32, i32) {
    %c0_i32 = arith.constant 0 : i32
    %c0_i32_0 = arith.constant 0 : i32
    %c0_i32_1 = arith.constant 0 : i32
    return %c0_i32, %c0_i32_0 : i32, i32
  }
  func.func @transform_4(%arg0: i32) -> (i32, i32, i32) {
    %c0_i32 = arith.constant 0 : i32
    %c0_i32_0 = arith.constant 0 : i32
    %c0_i32_1 = arith.constant 0 : i32
    return %arg0, %c0_i32, %c0_i32_0 : i32, i32, i32
  }
  func.func @transform_5(%arg0: i32) -> (i32, i32) {
    %c0_i32 = arith.constant 0 : i32
    %c0_i32_0 = arith.constant 0 : i32
    %c0_i32_1 = arith.constant 0 : i32
    return %c0_i32, %c0_i32_0 : i32, i32
  }
}

</mosaic_0001>

<bundles_post_ra>
// kernel: tpu_custom_call.1
= control target key start
LH: loop header
LB: loop body
LE: loop exit
PB: predicated region body
PF: predicated region fallthrough
CT: control target
= control target key end

     0   :  { %11 = vsyncpa [#allocation5], 0  ;;  %s1252_s0 = inlined_call_operand.hbm [shape: f32[8,8,16], index: 0, kind: input, shape index: {}]   ;;  %s1253_s1 = inlined_call_operand.hbm [shape: f32[16,128], index: 1, kind: input, shape index: {}]   ;;  %s1254_s2 = inlined_call_operand.hbm [shape: f32[32,128], index: 2, kind: input, shape index: {}]   ;;  %s1255_s3 = inlined_call_operand.vmem [shape: f32[1,128], index: 3, kind: input, shape index: {}]   ;;  %s1256_s4 = inlined_call_operand.hbm [shape: f32[8,8,32], index: 4, kind: output, shape index: {0}]   ;;  %s1257_s5 = inlined_call_operand.hbm [shape: f32[8,32], index: 5, kind: output, shape index: {1}]  }
   0x1   :  { %13 = vsyncpa [#allocation5 + $0x1], 0 }
   0x2   :  { %14 = vsyncpa [#allocation8], 0 }
   0x3   :  { %15 = vsyncpa [#allocation6], 0 }
   0x4   :  { %17 = vsyncpa [#allocation6 + $0x1], 0 }
   0x5   :  { %18 = vsyncpa [#allocation12], 0  ;;  %s985_s18 = smov 0   ;;  %s987_s19 = smov 0  }
   0x6   :  { %s989_s20 = smov 0   ;;  %s991_s21 = smov 0  }
   0x7 LB: > { %s1006_s22 = sadd.s32 4294967295, %s939_s21   ;;  %s605_s23 = sadd.s32 4294967294, %s939_s21   ;;  %s939_s21 = sphi %s991_s21, %s1281_s21   ;;  %s935_s20 = sphi %s989_s20, %s1280_s20   ;;  %s931_s19 = sphi %s987_s19, %s1279_s19   ;;  %s927_s18 = sphi %s985_s18, %s1278_s18  }
   0x8   : > { %p44_p0 = scmp.ne.s32.totalorder %s931_s19, %s927_s18  ;;  %p1258_p1 = scmp.eq.s32.totalorder %s1006_s22, 0 }
   0x9   : > { %p137_p3 = scmp.eq.s32.totalorder %s605_s23, 7  ;;  %p606_p5 = scmp.ge.s32.totalorder %s939_s21, 1 }
   0xa   : > { %p1015_p4 = por %p1258_p1, %p44_p0  ;;  %p165_p7 = scmp.lt.s32.totalorder %s939_s21, 9 }
   0xb   : > { %p1020_p6 = por %p137_p3, %p44_p0  ;;  %s941_s27 = smov [#allocation7]  }
   0xc   : > { %s1261_s24 = scalar_select %p1015_p4, 1, 0 }
   0xd   : > { %s1262_s25 = scalar_select %p1020_p6, 1, 0 }
   0xe   : > { %p1026_p9 = pnand %p606_p5, %p165_p7  ;;  %s177_s28 = sshll.u32 %s941_s27, 4  ;;  %s178_s28 = int_to_ptr.vmem [resolvable:$true] %s177_s28 }
   0xf   : > { %s942_s30 = smov [#allocation9]   ;;  %s753_s9 = scalar_lea.hbm %s1253_s1, 256 }
  0x10   : > { %s1263_s26 = scalar_select %p1026_p9, 1, 0 }
  0x11   : > { %p678_p10 = pneg %p1026_p9  ;;  %s190_s6 = sshll.u32 %s942_s30, 4  ;;  %s1038_s6 = int_to_ptr.vmem [resolvable:$true] %s190_s6 }
  0x12   : > { %p754_p12 = scmp.ne.s32.totalorder %s1253_s1, %s753_s9  ;;  %p760_p5 = scmp.lt.u32.totalorder %s753_s9, %s1253_s1 }
  0x13   : > { %p1034_p11 = pnand %p678_p10, %p1258_p1 }
  0x15   : > { %p755_p13 = pneg %p1034_p11 }
  0x17   : > { %p756_p0 = pnand %p755_p13, %p754_p12 }
  0x19   : > { %p757_p3 = pneg %p756_p0 }
  0x1b   : > { %p762_p7 = pnand %p760_p5, %p757_p3 }
  0x1d   : > { %765 = shalt.err (!%p762_p7)
}
  0x1e   : > { %s766_s14 = scalar_lea.vmem %s178_s28, 256  ;;  %p774_p2 = scmp.lt.s32.totalorder %s178_s28, %s178_s28 }
  0x1f   : > { %p767_p10 = scmp.ne.s32.totalorder %s178_s28, %s766_s14  ;;  %p775_p6 = scmp.lt.s32.totalorder %s766_s14, %s766_s14 }
  0x21   : > { %p769_p8 = pnand %p767_p10, %p755_p13  ;;  %p776_p4 = por %p775_p6, %p774_p2 }
  0x23   : > { %p770_p1 = pneg %p769_p8 }
  0x25   : > { %p777_p9 = pnand %p776_p4, %p770_p1 }
  0x27   : > { %780 = shalt.err (!%p777_p9)
}
  0x28   : > { %s943_s15 = smov 128   ;;  %s944_s16 = smov 8  }
  0x29   : > { %681 = dma.hbm_to_vmem [thread:$0]  (!%p1034_p11), %s1253_s1, 256, %s178_s28, [#allocation8], %s943_s15, %s943_s15, %s944_s16  }
  0x2a   : > { %s781_s7 = scalar_lea.hbm %s1254_s2, 512 }
  0x2b   : > { %p782_p8 = scmp.ne.s32.totalorder %s1254_s2, %s781_s7  ;;  %p788_p4 = scmp.lt.u32.totalorder %s781_s7, %s1254_s2 }
  0x2d   : > { %p784_p1 = pnand %p782_p8, %p755_p13 }
  0x2f   : > { %p785_p2 = pneg %p784_p1 }
  0x31   : > { %p790_p6 = pnand %p788_p4, %p785_p2 }
  0x33   : > { %793 = shalt.err (!%p790_p6)
}
  0x34   : > { %s794_s28 = scalar_lea.vmem %s1038_s6, 512  ;;  %p802_p3 = scmp.lt.s32.totalorder %s1038_s6, %s1038_s6 }
  0x35   : > { %p795_p9 = scmp.ne.s32.totalorder %s1038_s6, %s794_s28  ;;  %p803_p5 = scmp.lt.s32.totalorder %s794_s28, %s794_s28 }
  0x37   : > { %p797_p12 = pnand %p795_p9, %p755_p13  ;;  %p804_p7 = por %p803_p5, %p802_p3 }
  0x39   : > { %p798_p0 = pneg %p797_p12 }
  0x3b   : > { %p805_p10 = pnand %p804_p7, %p798_p0 }
  0x3d   : > { %808 = shalt.err (!%p805_p10)
}
  0x3e   : > { %684 = dma.hbm_to_vmem [thread:$0]  (!%p1034_p11), %s1254_s2, 512, %s1038_s6, [#allocation8], %s943_s15, %s943_s15, %s944_s16  }
  0x3f   : > { %s1088_s14 = sadd.s32 1, %s939_s21   ;;  %s31_s29 = sadd.s32 1, %s935_s20 }
  0x40   : > { %s28_s17 = ssub.s32 %s939_s21, %s1088_s14  ;;  %p38_p13 = scmp.ne.s32.totalorder %s935_s20, %s931_s19 }
  0x41   : > { %p29_p8 = scmp.eq.s32.totalorder %s28_s17, 0  ;;  %p39_p1 = scmp.eq.s32.totalorder %s939_s21, 0 }
  0x42   : > { %p1265_p2 = scmp.eq.s32.totalorder %s1006_s22, 7  ;;  %p695_p6 = scmp.lt.s32.totalorder %s939_s21, 8 }
  0x43   : > { %s1104_s27 = scalar_select %p29_p8, %s935_s20, %s31_s29  }
  0x44   : > { %p1098_p4 = por %p1265_p2, %p38_p13  ;;  %p40_p9 = por %p39_p1, %p38_p13 }
  0x45   : > { %s207_s30 = sand.u32 1, %s935_s20   ;;  %s611_s6 = sshll.u32 %s939_s21, 7 }
  0x46   : > { %s610_s7 = sshll.u32 %s207_s30, 3  ;;  %s1111_s8 = scalar_lea.hbm %s1252_s0, %s611_s6 }
  0x47   : > { %s211_s9 = scalar_lea.vmem [#allocation4], %s610_s7  ;;  %p1115_p11 = pnand %p695_p6, %p40_p9 }
  0x48   : > { %s218_s10 = sshll.u32 %s211_s9, 4  ;;  %s208_s28 = scalar_lea.sflag [#allocation5], %s207_s30  ;;  %s1113_s10 = int_to_ptr.vmem [resolvable:$true] %s218_s10 }
  0x49   : > { %s809_s12 = scalar_lea.hbm %s1111_s8, 128  ;;  %p811_p0 = pneg %p1115_p11 }
  0x4a   : > { %p810_p12 = scmp.ne.s32.totalorder %s1111_s8, %s809_s12  ;;  %s814_s17 = scalar_lea.hbm %s1252_s0, 1024 }
  0x4b   : > { %p815_p7 = scmp.lt.u32.totalorder %s1111_s8, %s1252_s0  ;;  %p816_p10 = scmp.lt.u32.totalorder %s814_s17, %s809_s12 }
  0x4c   : > { %p812_p3 = pnand %p811_p0, %p810_p12  ;;  %p818_p8 = scmp.lt.u32.totalorder %s809_s12, %s1111_s8 }
  0x4d   : > { %p817_p13 = por %p816_p10, %p815_p7 }
  0x4e   : > { %p813_p5 = pneg %p812_p3 }
  0x4f   : > { %p819_p1 = por %p818_p8, %p817_p13 }
  0x51   : > { %p820_p2 = pnand %p819_p1, %p813_p5 }
  0x53   : > { %823 = shalt.err (!%p820_p2)
}
  0x54   : > { %s824_s30 = scalar_lea.vmem %s1113_s10, 128  ;;  %s945_s15 = smov [#allocation4]  }
  0x55   : > { %p825_p6 = scmp.ne.s32.totalorder %s1113_s10, %s824_s30  ;;  %s829_s16 = sshll.u32 %s945_s15, 4  ;;  %s830_s16 = int_to_ptr.vmem [resolvable:$false] %s829_s16 }
  0x56   : > { %s831_s9 = scalar_lea.vmem %s830_s16, 256  ;;  %p832_p3 = scmp.lt.s32.totalorder %s1113_s10, %s830_s16 }
  0x57   : > { %p827_p9 = pnand %p825_p6, %p811_p0  ;;  %p833_p7 = scmp.lt.s32.totalorder %s831_s9, %s824_s30 }
  0x59   : > { %p828_p12 = pneg %p827_p9  ;;  %p834_p10 = por %p833_p7, %p832_p3 }
  0x5b   : > { %p835_p13 = pnand %p834_p10, %p828_p12 }
  0x5d   : > { %838 = shalt.err (!%p835_p13)
}
  0x5e   : > { %688 = dma.hbm_to_vmem [thread:$0]  (!%p1115_p11), %s1111_s8, 128, %s1113_s10, %s208_s28  }
  0x5f   : > { %p1268_p5 = scmp.ne.s32.totalorder %s1263_s26, 0 }
  0x60   : > { %s1147_s12 = sand.u32 (!%p1268_p5), 1, %s931_s19   ;;  %p1269_p0 = scmp.ne.s32.totalorder (!%p1268_p5), %s1261_s24, 0 }
  0x61   : > { %227 = sbr.rel (%p1268_p5) target bundleno = 872 (0x368), region = 36  ;;  %s613_s13 = sshll.u32 (!%p1268_p5), %s1147_s12, 3 }
  0x62   : > { %s230_s29 = scalar_lea.sflag (!%p1268_p5), [#allocation5], %s1147_s12  ;;  %s1151_s17 = scalar_lea.vmem (!%p1268_p5), [#allocation4], %s613_s13 }
  0x68   : > { %910 = dma.done.wait (%p1269_p0), %s230_s29, 128  }
  0x69   : > { %912 = vsyncadd (%p1269_p0), %s230_s29, 4294967168  ;;  %p1270_p11 = scmp.eq.s32.totalorder %s1006_s22, 0 }
  0x6b   : > { %914 = dma.done.wait (%p1270_p11), [#allocation8], 768   ;;  %p1271_p8 = pmov %p1270_p11 }
  0x6c   : > { %s1161_s26 = scalar_lea.vmem [#allocation10], %s613_s13  ;;  %p1272_p1 = scmp.ne.s32.totalorder %s1006_s22, 0 }
  0x6d   : > { %916 = vsyncadd (%p1271_p8), [#allocation8], 4294966528  ;;  %vm272_vm0 = vcmask (!%p1272_p1), 261120   ;;  %v946_v0 = vmov (!%p1272_p1), 0.0  }
  0x6e   : > { %271 = sbr.rel (%p1272_p1) target bundleno = 117 (0x75), region = 52  ;;  %273 = vst.msk [vmem:[#allocation2] sm:$0xff] (!%p1272_p1), %vm272_vm0, %v946_v0  ;;  %274 = vst.msk [vmem:[#allocation3] sm:$0xff] (!%p1272_p1), %vm272_vm0, %v946_v0 }
  0x75 PF: > { %v280_v1 = vld [vmem:[#allocation9] sm:$0xff]  ;;  %v281_v2 = vld [vmem:[#allocation9 + $0x8] sm:$0xff]  ;;  %v278_v3 = vld [vmem:[#allocation7] sm:$0xff]  ;;  %v947_v4 = vmov 0.0|0.0   ;;  %vm948_vm1 = vmmov 0   ;;  %v949_v10 = vmov 0.0  }
  0x76   : > { %653 = vmatprep.subr.bf16.mxu0 %v947_v4  ;;  %v654_v5 = vpack.c.bf16 %v281_v2, %v280_v1  ;;  %659 = vmatprep.subr.bf16.mxu1 %v947_v4  ;;  %v279_v6 = vld [vmem:[#allocation7 + $0x8] sm:$0xff]  ;;  %v282_v7 = vld [vmem:[#allocation9 + $0x10] sm:$0xff]  ;;  %v275_v12 = vld [vmem:[%s1151_s17] sm:$0xff]  ;;  %vm358_vm2 = vcmask 130048   ;;  %vm284_vm3 = vcmask 261120   ;;  %s950_s10 = smov 64  }
  0x77   : > { %v283_v8 = vld [vmem:[#allocation9 + $0x18] sm:$0xff]  ;;  %v660_v9 = vpack.c.bf16 %v279_v6, %v278_v3  ;;  %650 = vmatprep.mubr.msk.f32.mxu1 %vm948_vm1, %v949_v10  ;;  %643 = vmatprep.mubr.msk.f32.mxu0 %vm948_vm1, %v949_v10  ;;  %v276_v13 = vld [vmem:[#allocation2] sm:$0xff]  ;;  %s951_s11 = smov 32   ;;  %s952_s28 = smov 96  }
  0x78   : > { %655 = vmatpush3.bf16.msra.mxu0 %v654_v5  ;;  %v657_v11 = vpack.c.bf16 %v283_v8, %v282_v7  ;;  %v620_v17 = vld [vmem:[%s1255_s3] ss:$0 sm:$0xff]  ;;  %v277_v22 = vld [vmem:[#allocation3] sm:$0xff]  ;;  %s622_s7 = sshll.u32 %s1006_s22, 7  ;;  %s494_s6 = sshll.u32 %s1161_s26, 4  ;;  %s1178_s6 = int_to_ptr.vmem [resolvable:$true] %s494_s6 }
  0x79   : > { %656 = vmatprep.subr.bf16.mxu0 %v947_v4  ;;  %661 = vmatpush3.bf16.msra.mxu1 %v660_v9  ;;  %s953_s30 = smov [#allocation11]   ;;  %s1176_s13 = scalar_lea.hbm %s1256_s4, %s622_s7 }
  0x7a   : > { %s505_s15 = sshll.u32 %s953_s30, 4  ;;  %s481_s29 = scalar_lea.sflag [#allocation6], %s1147_s12  ;;  %s1180_s15 = int_to_ptr.vmem [resolvable:$true] %s505_s15 }
  0x7b   : > { %s839_s17 = scalar_lea.vmem %s1178_s6, 128  ;;  %s954_s24 = smov [#allocation10]  }
  0x7c   : > { %658 = vmatpush3.bf16.msra.mxu0 %v657_v11  ;;  %651 = vmatmul.mubr.msk.f32.vlgmr.msra.gmra.mrb[0].mxu1 %vm358_vm2, %v275_v12  ;;  %p840_p2 = scmp.ne.s32.totalorder %s1178_s6, %s839_s17  ;;  %s843_s8 = sshll.u32 %s954_s24, 4  ;;  %s844_s8 = int_to_ptr.vmem [resolvable:$false] %s843_s8 }
  0x7d   : > { %p846_p12 = scmp.lt.s32.totalorder %s1178_s6, %s844_s8 }
  0x7e   : > { %p841_p6 = pnand %p840_p2, %p1098_p4 }
  0x7f   : > { %644 = vmatmul.mubr.msk.f32.vlgmr.msra.gmra.mrb[0].mxu0 %vm284_vm3, %v276_v13 }
  0x80   : > { %p842_p9 = pneg %p841_p6 }
 0x14f   : > { %v428_v14 = vpop.f32.mrb[0].mxu1 }
 0x150   : > { %v652_v15 = vpop.f32.mrb[1].mxu1 }
 0x152   : > { %v354_v16 = vpop.f32.mrb[0].mxu0 }
 0x153   : > { %v429_v18 = vadd.f32 %v428_v14, %v354_v16  ;;  %v645_v19 = vpop.f32.mrb[1].mxu0 }
 0x155   : > { %v439_v20 = vadd.f32 %v620_v17, %v429_v18 }
 0x157   : > { %745 = vtanh.f32 %v439_v20  ;;  %v440_v23 = vsub.f32 0.0, %v439_v20 }
 0x159   : > { %v441_v24 = vmul.f32 1.442695, %v440_v23 }
 0x15b   : > { %747 = vpow2.f32 %v441_v24 }
 0x161   : > { %v746_v21 = vpop.eup %745 }
 0x162   : > { %453 = vrot.lane.b32.xlu0 %v746_v21, %s950_s10 }
 0x165   : > { %v748_v25 = vpop.eup %747 }
 0x166   : > { %448 = vrot.lane.b32.xlu0 %v277_v22, %s951_s11  ;;  %v443_v26 = vadd.f32 1.0, %v748_v25 }
 0x168   : > { %749 = vrcp.f32 %v443_v26 }
 0x172   : > { %v750_v27 = vpop.eup %749 }
 0x1d4   : > { %v454_v28 = vpop.permute.xlu0 %453 }
 0x1d5   : > { %v456_v29 = vmul.f32 %v750_v27, %v454_v28 }
 0x1d7   : > { %458 = vrot.lane.b32.xlu1 %v456_v29, %s951_s11 }
 0x1d8   : > { %v449_v30 = vpop.permute.xlu0 %448 }
 0x1d9   : > { %v451_v31 = vmul.f32 %v750_v27, %v449_v30 }
 0x249   : > { %v459_v32 = vpop.permute.xlu1 %458 }
 0x24a   : > { %v461_v33 = vadd.f32 %v459_v32, %v451_v31 }
 0x24c   : > { %751 = vtanh.f32 %v461_v33 }
 0x256   : > { %v752_v34 = vpop.eup %751 }
 0x257   : > { %464 = vrot.lane.b32.xlu1 %v752_v34, %s950_s10  ;;  %s845_s10 = scalar_lea.vmem %s844_s8, 256 }
 0x258   : > { %p847_p3 = scmp.lt.s32.totalorder %s845_s10, %s839_s17 }
 0x25a   : > { %p848_p7 = por %p847_p3, %p846_p12 }
 0x25b   : > { %474 = vrot.lane.b32.xlu1 %v461_v33, %s952_s28 }
 0x25c   : > { %p849_p10 = pnand %p848_p7, %p842_p9 }
 0x2c9   : > { %v465_v35 = vpop.permute.xlu1 %464 }
 0x2ca   : > { %v467_v36 = vmul.f32 %v750_v27, %v465_v35 }
 0x2cc   : > { %469 = vrot.lane.b32.xlu0 %v467_v36, %s951_s11 }
 0x2cd   : > { %v475_v37 = vpop.permute.xlu1 %474 }
 0x2ce   : > { %477 = vst.msk [vmem:[#allocation3] sm:$0xff] %vm284_vm3, %v475_v37 }
 0x33e   : > { %v470_v38 = vpop.permute.xlu0 %469 }
 0x33f   : > { %472 = vst.msk [vmem:[#allocation2] sm:$0xff] %vm284_vm3, %v470_v38  ;;  %478 = vst.msk [vmem:[%s1161_s26] sm:$0xff] %vm284_vm3, %v470_v38 }
 0x340   : > { %479 = vst.msk [vmem:[#allocation11] sm:$0xff] %vm284_vm3, %v470_v38 }
 0x341   : > { %852 = shalt.err (!%p849_p10)
}
 0x342   : > { %s853_s12 = scalar_lea.hbm %s1176_s13, 128  ;;  %s857_s28 = scalar_lea.hbm %s1256_s4, 1024 }
 0x343   : > { %p854_p13 = scmp.ne.s32.totalorder %s1176_s13, %s853_s12  ;;  %p858_p11 = scmp.lt.u32.totalorder %s1176_s13, %s1256_s4 }
 0x344   : > { %p859_p8 = scmp.lt.u32.totalorder %s857_s28, %s853_s12  ;;  %p861_p2 = scmp.lt.u32.totalorder %s853_s12, %s1176_s13 }
 0x345   : > { %p855_p5 = pnand %p854_p13, %p1098_p4 }
 0x346   : > { %p860_p1 = por %p859_p8, %p858_p11 }
 0x347   : > { %p856_p0 = pneg %p855_p5 }
 0x348   : > { %p862_p6 = por %p861_p2, %p860_p1 }
 0x34a   : > { %p863_p9 = pnand %p862_p6, %p856_p0 }
 0x34c   : > { %866 = shalt.err (!%p863_p9)
}
 0x34d   : > { %672 = dma.vmem_to_hbm [thread:$0]  (%p1098_p4), %s1178_s6, 128, %s1176_s13, %s481_s29  }
 0x34e   : > { %s867_s16 = scalar_lea.vmem %s1180_s15, 128  ;;  %p1273_p3 = scmp.eq.s32.totalorder %s1006_s22, 7 }
 0x34f   : > { %p868_p12 = scmp.ne.s32.totalorder %s1180_s15, %s867_s16  ;;  %p874_p13 = scmp.lt.s32.totalorder %s1180_s15, %s1180_s15 }
 0x350   : > { %p875_p5 = scmp.lt.s32.totalorder %s867_s16, %s867_s16 }
 0x351   : > { %p869_p7 = pnand %p868_p12, %p1273_p3 }
 0x352   : > { %p876_p11 = por %p875_p5, %p874_p13 }
 0x353   : > { %p870_p10 = pneg %p869_p7 }
 0x355   : > { %p877_p0 = pnand %p876_p11, %p870_p10 }
 0x357   : > { %880 = shalt.err (!%p877_p0)
}
 0x358   : > { %s881_s17 = scalar_lea.hbm %s1257_s5, 128  ;;  %p1274_p8 = pmov %p1273_p3 }
 0x359   : > { %p882_p4 = scmp.ne.s32.totalorder %s1257_s5, %s881_s17  ;;  %p887_p6 = scmp.lt.u32.totalorder %s881_s17, %s1257_s5 }
 0x35b   : > { %p883_p1 = pnand %p882_p4, %p1274_p8 }
 0x35d   : > { %p884_p2 = pneg %p883_p1 }
 0x35f   : > { %p889_p9 = pnand %p887_p6, %p884_p2 }
 0x361   : > { %892 = shalt.err (!%p889_p9)
}
 0x362   : > { %p1275_p12 = pmov %p1273_p3 }
 0x364   : > { %674 = dma.vmem_to_hbm [thread:$0]  (%p1275_p12), %s1180_s15, 128, %s1257_s5, [#allocation12]  }
 0x365   : > { %918 = dma.done.wait (%p1273_p3), [#allocation12], 128   ;;  %p1276_p7 = pmov %p1273_p3 }
 0x367   : > { %920 = vsyncadd (%p1276_p7), [#allocation12], 4294967168 }
 0x368 PF: > { %p700_p10 = scmp.ge.s32.totalorder %s939_s21, 2  ;;  %s521_s12 = sand.u32 1, %s927_s18  }
 0x369   : > { %p1277_p13 = scmp.ne.s32.totalorder %s1262_s25, 0  ;;  %s522_s26 = scalar_lea.sflag [#allocation6], %s521_s12 }
 0x36b   : > { %p690_p5 = pnand %p700_p10, %p1277_p13 }
 0x36d   : > { %922 = dma.done.wait (!%p690_p5), %s522_s26, 128  }
 0x36e   : > { %924 = vsyncadd (!%p690_p5), %s522_s26, 4294967168  ;;  %p21_p11 = scmp.ge.s32.totalorder %s1088_s14, 10   ;;  %s1278_s18 = smov %s931_s19 }
 0x36f   : > { %s1279_s19 = smov %s935_s20  ;;  %s1280_s20 = smov %s1104_s27 }
 0x370   : > { %s1281_s21 = smov %s1088_s14  ;;  %23 = sbr.rel (!%p21_p11) target bundleno = 7 (0x7), region = 101 }
 0x377   :  { %527 = vsyncpa [#allocation5], 1 }
 0x378   :  { %529 = vsyncpa [#allocation5 + $0x1], 1 }
 0x379   :  { %530 = vsyncpa [#allocation8], 1 }
 0x37a   :  { %531 = vsyncpa [#allocation6], 1 }
 0x37b   :  { %533 = vsyncpa [#allocation6 + $0x1], 1 }
 0x37c   :  { %534 = vsyncpa [#allocation12], 1 }

</bundles_post_ra>
